<compile_context>
chip_gen: v6e
topology: v6e:2x2x1
jax: 0.10.0
libtpu: 0.0.40
codegen_flags: <defaults>
</compile_context>

<pallas_src>
import functools

import jax
import jax.numpy as jnp
from jax import lax
from jax.experimental import pallas as pl
from jax.experimental.pallas import tpu as pltpu


def _round_up(x, m):
    return int(pl.cdiv(x, m) * m)


def _vmem_capacity_bytes():
    try:
        return int(pltpu.get_tpu_info().vmem_capacity_bytes)
    except Exception:
        return 64 * 1024 * 1024  # conservative (v7x-sized) fallback


def _gram_kernel(layer_ref, out_ref):
    """'l2'/'cosine': accumulate Gram = X X^T over D chunks (MXU, no transpose)."""
    k = pl.program_id(1)

    @pl.when(k == 0)
    def _init():
        out_ref[...] = jnp.zeros_like(out_ref)

    x = layer_ref[...]                                        # (N, d_chunk)
    g = lax.dot_general(
        x, x,
        dimension_numbers=(((1,), (1,)), ((), ())),           # contract feature dim of both
        preferred_element_type=jnp.float32)                   # (N, N) f32
    out_ref[...] += g[jnp.newaxis]


def _l1_kernel(layer_ref, out_ref, acc_ref, *, groups):
    """'l1': accumulate sum_k |x_i[k]-x_j[k]| lane-parallel into (N, N, 128)."""
    k = pl.program_id(1)

    @pl.when(k == 0)
    def _init():
        acc_ref[...] = jnp.zeros_like(acc_ref)

    # Hot loop: one (N, 128) slice per 128-lane group, VALU subtract/abs/add only.
    # TODO(synk): on v6e/v7x the subtract/abs could stay in bf16 for bf16 inputs
    # (bf16 VALUs); kept f32 here so the same code is exact-safe on v5e.
    @pl.loop(0, groups)
    def _group(g):
        off = pl.multiple_of(g * 128, 128)
        xg = layer_ref[:, pl.ds(off, 128)].astype(jnp.float32)      # (N, 128)
        acc_ref[...] += jnp.abs(xg[:, None, :] - xg[None, :, :])    # (N, N, 128)

    @pl.when(k == pl.num_programs(1) - 1)
    def _done():
        out_ref[...] = jnp.sum(acc_ref[...], axis=-1)[jnp.newaxis]  # (1, N, N)


def diversity_loss(noises, layer, metric="l2", max_chunk_override=None):
    """JAX/Pallas equivalent of DiversityLoss(metric).forward(noises, layer)."""
    if metric not in ("l1", "l2", "cosine"):
        raise ValueError(metric)

    if layer.ndim > 2:
        layer = layer.reshape((layer.shape[0], -1))           # NCHW -> (N, C*H*W)

    # Keep bf16 operands native for the MXU; everything else goes to f32.
    if layer.dtype not in (jnp.bfloat16, jnp.float32):
        layer = layer.astype(jnp.float32)

    n, d = layer.shape
    itemsize = jnp.dtype(layer.dtype).itemsize

    # ---- generation-aware chunk / VMEM budgeting --------------------------
    vmem_cap = _vmem_capacity_bytes()
    budget = min(int(vmem_cap * 0.7), 96 * 1024 * 1024)       # ~45 MiB v7x, ~90 MiB v5e/v6e
    input_budget = max(budget - (4 << 20), 8 << 20)           # headroom for out/scratch
    max_chunk = max(512, (input_budget // (2 * n * itemsize)) // 128 * 128)
    max_chunk = min(max_chunk, 128 * 1024)                    # long contiguous DMA rows
    if max_chunk_override is not None:
        max_chunk = max(128, (max_chunk_override // 128) * 128)

    d_chunk = min(max_chunk, _round_up(d, 128))
    num_chunks = int(pl.cdiv(d, d_chunk))
    num_splits = 2 if num_chunks >= 2 else 1                  # engage both v7x TCs
    chunks_per_split = int(pl.cdiv(num_chunks, num_splits))
    d_pad = num_splits * chunks_per_split * d_chunk
    if d_pad != d:
        layer = jnp.pad(layer, ((0, 0), (0, d_pad - d)))      # zeros are neutral

    if metric == "l1":
        kernel = functools.partial(_l1_kernel, groups=d_chunk // 128)
        scratch = [pltpu.VMEM((n, n, 128), jnp.float32)]
        flops = 3 * n * n * d_pad
    else:
        kernel = _gram_kernel
        scratch = []
        flops = 2 * n * n * d_pad

    cost = pl.CostEstimate(
        flops=flops,
        transcendentals=0,
        bytes_accessed=n * d_pad * itemsize + num_splits * n * n * 4)

    def layer_index_map(c, k):
        return (0, c * chunks_per_split + k)

    partial_sums = pl.pallas_call(
        kernel,
        out_shape=jax.ShapeDtypeStruct((num_splits, n, n), jnp.float32),
        grid_spec=pltpu.PrefetchScalarGridSpec(
            num_scalar_prefetch=0,
            grid=(num_splits, chunks_per_split),
            in_specs=[pl.BlockSpec((n, d_chunk), layer_index_map)],
            out_specs=pl.BlockSpec((1, n, n), lambda c, k: (c, 0, 0)),
            scratch_shapes=scratch),
        compiler_params=pltpu.CompilerParams(
            dimension_semantics=("parallel", "arbitrary"),
            vmem_limit_bytes=budget),
        cost_estimate=cost,
    )(layer)

    # ---- tiny O(N^2) finalize in plain JAX (hoisted out of the kernel) ----
    acc = jnp.sum(partial_sums, axis=0)                       # (N, N) f32
    if metric == "l1":
        layer_dist = acc * (1.0 / float(d))
    elif metric == "l2":
        sqn = jnp.diagonal(acc)                               # ||x_i||^2
        layer_dist = jnp.maximum(
            sqn[:, None] + sqn[None, :] - 2.0 * acc, 0.0) * (1.0 / float(d))
    else:  # cosine: 1 - x_i.x_j / max(||x_i||*||x_j||, 1e-8)
        sqn = jnp.diagonal(acc)
        denom = jnp.maximum(jnp.sqrt(sqn[:, None] * sqn[None, :]), 1e-8)
        layer_dist = 1.0 - acc / denom

    noises = noises.astype(jnp.float32)
    ndiff = noises[:, None, :] - noises[None, :, :]
    noise_dist = jnp.mean(ndiff * ndiff, axis=-1)             # always l2

    return jnp.exp(jnp.mean(-noise_dist * layer_dist))


def _reference(noises, layer, metric="l2"):
    """Pure-jnp reference mirroring the PyTorch module, for validation."""
    if layer.ndim > 2:
        layer = layer.reshape((layer.shape[0], -1))
    layer = layer.astype(jnp.float32)
    noises = noises.astype(jnp.float32)

    def pairwise(t, how):
        t1 = jnp.broadcast_to(t[None, :, :], (t.shape[0],) + t.shape)  # t1[i,j]=t[j]
        t2 = t[:, None, :]                                             # t2[i,j]=t[i]
        if how == "l1":
            return jnp.mean(jnp.abs(t1 - t2), axis=2)
        if how == "l2":
            return jnp.mean((t1 - t2) ** 2, axis=2)
        if how == "cosine":
            dots = jnp.sum(t1 * t2, axis=2)
            n1 = jnp.linalg.norm(t1, axis=2)
            n2 = jnp.linalg.norm(t2, axis=2)
            return 1.0 - dots / jnp.maximum(n1 * n2, 1e-8)
        raise ValueError(how)

    layer_dist = pairwise(layer, metric)
    noise_dist = pairwise(noises, "l2")
    return jnp.exp(jnp.mean(-noise_dist * layer_dist))


if __name__ == "__main__":
    key = jax.random.PRNGKey(0)

    N, Z = 8, 32
    # (shape, forced max_chunk):
    #  * D=300: exercises lane-alignment zero padding, single chunk.
    #  * D=4096: larger D, still one big chunk under the VMEM-derived cap.
    #  * D=4096 with a forced 256-column chunk: exercises multi-chunk
    #    accumulation and the 2-way "parallel" split path on every generation.
    cases = [
        ((N, 3, 10, 10), None),
        ((N, 4, 32, 32), None),
        ((N, 4, 32, 32), 256),
    ]

    for shape, chunk_override in cases:
        k1, k2, key = jax.random.split(key, 3)
        layer = jax.random.normal(k1, shape, dtype=jnp.float32)
        noises = jax.random.normal(k2, (N, Z), dtype=jnp.float32)
        for metric in ("l2", "l1", "cosine"):
            out = diversity_loss(noises, layer, metric=metric,
                                 max_chunk_override=chunk_override)
            out = jax.block_until_ready(out)
            ref = _reference(noises, layer, metric=metric)
            # Tolerance leaves headroom for the Gram-matrix (||xi||^2+||xj||^2-2xi.xj)
            # cancellation vs. the direct-difference reference.
            assert jnp.allclose(out, ref, rtol=5e-3, atol=5e-4), (
                shape, metric, chunk_override, float(out), float(ref))

    print("KERNEL_OK")
</pallas_src>

<mosaic_0001>
module attributes {stable_mosaic.version = 11 : i64} {
  func.func @_gram_kernel(%arg0: i32, %arg1: i32, %arg2: memref<8x384xf32, #tpu.memory_space<vmem>>, %arg3: memref<1x8x8xf32, #tpu.memory_space<vmem>>) attributes {dimension_semantics = [#tpu.dimension_semantics<parallel>, #tpu.dimension_semantics<arbitrary>], iteration_bounds = array<i64: 1, 1>, scalar_prefetch = 0 : i64, scratch_operands = 0 : i64, tpu.core_type = #tpu.core_type<tc>, window_params = [{transform_indices = @transform_0, window_bounds = array<i64: 8, 384>}, {transform_indices = @transform_1, window_bounds = array<i64: 1, 8, 8>}]} {
    %c0_i32 = arith.constant 0 : i32
    %0 = arith.cmpi eq, %arg1, %c0_i32 : i32
    %1 = arith.extui %0 : i1 to i32
    %c0_i32_0 = arith.constant 0 : i32
    %2 = arith.cmpi ne, %1, %c0_i32_0 : i32
    scf.if %2 {
      %cst_8 = arith.constant 0.000000e+00 : f32
      %9 = vector.broadcast %cst_8 : f32 to vector<1x8x8xf32>
      %c0_9 = arith.constant 0 : index
      %c0_10 = arith.constant 0 : index
      %c0_11 = arith.constant 0 : index
      %10 = vector.load %arg3[%c0_9, %c0_10, %c0_11] : memref<1x8x8xf32, #tpu.memory_space<vmem>>, vector<1x8x8xf32>
      tpu.vector_store %arg3[%c0_9, %c0_10, %c0_11], %9 {strides = array<i32>} : memref<1x8x8xf32, #tpu.memory_space<vmem>>, vector<1x8x8xf32>,
    } else {
    }
    %c0 = arith.constant 0 : index
    %c0_1 = arith.constant 0 : index
    %3 = vector.load %arg2[%c0, %c0_1] : memref<8x384xf32, #tpu.memory_space<vmem>>, vector<8x384xf32>
    %cst = arith.constant dense<0.000000e+00> : vector<8x8xf32>
    %4 = tpu.matmul %3, %3, %cst {dimension_numbers = #tpu.dot_dimension_numbers<[1], [1], [0], [0], [0, 0, 1, 0], [], []>} : vector<8x384xf32>, vector<8x384xf32>, vector<8x8xf32> -> vector<8x8xf32>
    %c0_2 = arith.constant 0 : index
    %c0_3 = arith.constant 0 : index
    %c0_4 = arith.constant 0 : index
    %5 = vector.load %arg3[%c0_2, %c0_3, %c0_4] : memref<1x8x8xf32, #tpu.memory_space<vmem>>, vector<1x8x8xf32>
    %6 = vector.shape_cast %4 : vector<8x8xf32> to vector<1x8x8xf32>
    %7 = arith.addf %5, %6 : vector<1x8x8xf32>
    %c0_5 = arith.constant 0 : index
    %c0_6 = arith.constant 0 : index
    %c0_7 = arith.constant 0 : index
    %8 = vector.load %arg3[%c0_5, %c0_6, %c0_7] : memref<1x8x8xf32, #tpu.memory_space<vmem>>, vector<1x8x8xf32>
    tpu.vector_store %arg3[%c0_5, %c0_6, %c0_7], %7 {strides = array<i32>} : memref<1x8x8xf32, #tpu.memory_space<vmem>>, vector<1x8x8xf32>,
    return
  }
  func.func @transform_0(%arg0: i32, %arg1: i32) -> (i32, i32) {
    %c1_i32 = arith.constant 1 : i32
    %0 = arith.muli %arg0, %c1_i32 : i32
    %1 = arith.addi %0, %arg1 : i32
    %c0_i32 = arith.constant 0 : i32
    %c0_i32_0 = arith.constant 0 : i32
    return %c0_i32, %1 : i32, i32
  }
  func.func @transform_1(%arg0: i32, %arg1: i32) -> (i32, i32, i32) {
    %c0_i32 = arith.constant 0 : i32
    %c0_i32_0 = arith.constant 0 : i32
    %c0_i32_1 = arith.constant 0 : i32
    return %arg0, %c0_i32, %c0_i32_0 : i32, i32, i32
  }
}

</mosaic_0001>

<bundles_post_ra>
// kernel: tpu_custom_call.1
= control target key start
LH: loop header
LB: loop body
LE: loop exit
PB: predicated region body
PF: predicated region fallthrough
CT: control target
= control target key end

     0   :  { %6 = vsyncpa [#allocation3], 0  ;;  %s272_s0 = inlined_call_operand.hbm [shape: f32[8,384], index: 0, kind: input, shape index: {}]   ;;  %s273_s1 = inlined_call_operand.hbm [shape: f32[1,8,8], index: 1, kind: output, shape index: {}]  }
   0x1   :  { %7 = vsyncpa [#allocation4], 0  ;;  %s250_s6 = smov [#allocation2]  }
   0x2   :  { %s18_s7 = sshll.u32 %s250_s6, 4  ;;  %s19_s7 = int_to_ptr.vmem [resolvable:$true] %s18_s7 }
   0x3   :  { %s214_s8 = scalar_lea.vmem %s19_s7, 384  ;;  %p219_p1 = scmp.lt.s32.totalorder %s19_s7, %s19_s7 }
   0x4   :  { %p215_p0 = scmp.ne.s32.totalorder %s19_s7, %s214_s8  ;;  %p220_p2 = scmp.lt.s32.totalorder %s214_s8, %s214_s8 }
   0x6   :  { %p221_p3 = por %p220_p2, %p219_p1 }
   0x8   :  { %p222_p4 = pnand %p221_p3, %p215_p0 }
   0xa   :  { %225 = shalt.err (!%p222_p4)
}
   0xb   :  { %21 = dma.hbm_to_vmem [thread:$0]  %s272_s0, 384, %s19_s7, [#allocation3]  }
   0xc   :  { %246 = dma.done.wait [#allocation3], 384  }
   0xd   :  { %247 = vsyncadd [#allocation3], 4294966912  ;;  %vm31_vm0 = vcmask 64512   ;;  %v251_v0 = vmov 0.0   ;;  %vm252_vm1 = vmmov 0   ;;  %v34_v1 = vld [vmem:[#allocation2 + $0x8] sm:$0xff] }
   0xe   :  { %32 = vst.msk [vmem:[#allocation5] sm:$0xff] %vm31_vm0, %v251_v0  ;;  %197 = vmatprep.subr.mxu1 %v251_v0  ;;  %199 = vmatprep.mubr.msk.f32.mxu1 %vm252_vm1, %v251_v0  ;;  %v35_v2 = vld [vmem:[#allocation2 + $0x10] sm:$0xff]  ;;  %v33_v3 = vld [vmem:[#allocation2] sm:$0xff]  ;;  %s253_s0 = smov [#allocation5]  }
   0xf   :  { %66 = vmatprep.subr.mxu0 %v34_v1  ;;  %198 = vmatpush3.xpose.msra.mxu1 %v35_v2  ;;  %s186_s11 = sshll.u32 %s253_s0, 4  ;;  %s187_s11 = int_to_ptr.vmem [resolvable:$true] %s186_s11 }
  0x10   :  { %67 = vmatpush1.xpose.msra.mxu0 %v33_v3  ;;  %100 = vmatprep.mubr.f32.mxu0 %v34_v1  ;;  %s226_s12 = scalar_lea.vmem %s187_s11, 128  ;;  %p231_p6 = scmp.lt.s32.totalorder %s187_s11, %s187_s11 }
  0x11   :  { %p227_p5 = scmp.ne.s32.totalorder %s187_s11, %s226_s12  ;;  %p232_p7 = scmp.lt.s32.totalorder %s226_s12, %s226_s12 }
  0x12   :  { %200 = vmatmul.mubr.f32.vlgmr.msra.gmra.mxu1 %v35_v2 }
  0x13   :  { %101 = vmatmul.mubr.f32.vlgmr.msra.gmra.mxu0 %v33_v3  ;;  %p233_p8 = por %p232_p7, %p231_p6 }
  0x15   :  { %v176_v6 = vld [vmem:[#allocation5] sm:$0xff]  ;;  %p234_p9 = pnand %p233_p8, %p227_p5 }
  0xd2   :  { %v172_v4 = vpop.f32.mrf.mxu1 }
  0xd3   :  { %v102_v5 = vpop.f32.mrf.mxu0 }
  0xd4   :  { %v173_v7 = vadd.f32 %v172_v4, %v102_v5  ;;  %v201_v8 = vpop.f32.mrf.mxu1 }
  0xd5   :  { %v104_v9 = vpop.f32.mrf.mxu0 }
  0xd6   :  { %v177_v10 = vadd.f32 %v176_v6, %v173_v7 }
  0xd8   :  { %179 = vst.msk [vmem:[#allocation5] sm:$0xff] %vm31_vm0, %v177_v10 }
  0xd9   :  { %237 = shalt.err (!%p234_p9)
}
  0xda   :  { %189 = dma.vmem_to_hbm [thread:$0]  %s187_s11, 128, %s273_s1, [#allocation4]  }
  0xdb   :  { %248 = dma.done.wait [#allocation4], 128  }
  0xdc   :  { %249 = vsyncadd [#allocation4], 4294967168 }
  0xdd   :  { %193 = vsyncpa [#allocation3], 1 }
  0xde   :  { %194 = vsyncpa [#allocation4], 1 }

</bundles_post_ra>
